<compile_context>
chip_gen: v5e
topology: v5e:2x2
jax: 0.10.0
libtpu: 0.0.40
codegen_flags: <defaults>
</compile_context>

<pallas_src>
import functools

import numpy as np

import jax
import jax.numpy as jnp
from jax.experimental import pallas as pl
from jax.experimental.pallas import tpu as pltpu

EPS = 1e-5


def _decoder_kernel(x_ref, idx_ref, lin_ref, rmask_ref,
                    w1_ref, b1_ref, w2_ref, b2_ref,
                    out_ref, pad1_ref, pad2_ref, *, n_blk, Hu):
    # x_ref / idx_ref : (n_blk*Hu, Wp*C_in)      row-duplicated, lane-packed pooled data
    # lin_ref         : (n_blk*Hu, Wp*C_in) i32  lin[h, wp*C+c] = h*Wu + 2*wp (constant)
    # rmask_ref       : (M, 1) f32               1.0 on per-image rows, 0.0 on bleed rows
    # w1_ref          : (3, Wu*C_in,  Wu*C_out)  bf16 banded conv1 weights (BN folded,
    #                                            even/odd-W split baked into row order)
    # w2_ref          : (3, Wu*C_out, Wu*C_out)  bf16 banded conv2 weights (BN folded)
    # b*_ref          : (1, Wu*C_out) f32        per-channel bias tiled over W
    # out_ref         : (n_blk*Hu, Wu*C_out)     lane-packed output
    # pad1_ref        : (n_blk*(Hu+2), Wu*C_in)  f32 row-halo scratch for conv1
    # pad2_ref        : (n_blk*(Hu+2), Wu*C_out) f32 row-halo scratch for conv2
    P = Hu + 2                       # per-image row pitch (1 halo + Hu + 1 halo)
    M = n_blk * P - 2                # stacked matmul rows (interiors + bleed rows)

    # One unmasked full-width zero store per scratch covers all halo rows; interior
    # rows are overwritten below.  (Per-step, not program_id==0-gated: see header.)
    pad1_ref[...] = jnp.zeros(pad1_ref.shape, pad1_ref.dtype)
    pad2_ref[...] = jnp.zeros(pad2_ref.shape, pad2_ref.dtype)

    # ---- max_unpool2d(kernel=2, stride=2, padding=0), packed-2D even/odd split ----
    # d == 0 -> pooled value lands in even unpooled column 2*wp of this row,
    # d == 1 -> odd column 2*wp+1.  Columns [0:Wp*C) of u hold the even-W plane,
    # [Wp*C:2*Wp*C) the odd-W plane; the interleave is folded into w1's row order.
    d = idx_ref[...] - lin_ref[...]
    x = x_ref[...]
    u = jnp.concatenate([jnp.where(d == 0, x, 0.0),
                         jnp.where(d == 1, x, 0.0)], axis=-1)   # (n_blk*Hu, Wu*C_in)
    for n in range(n_blk):                                      # static unroll
        pad1_ref[n * P + 1:n * P + 1 + Hu, :] = u[n * Hu:(n + 1) * Hu, :]

    # ---- BasicConv 1: Conv3x3 (BN folded into weights) + bias + ReLU ----
    lhs1 = pad1_ref[...].astype(jnp.bfloat16)          # single f32->bf16 cast per conv
    acc1 = jnp.dot(lhs1[0:M, :], w1_ref[0], preferred_element_type=jnp.float32)
    for dy in range(1, 3):
        acc1 += jnp.dot(lhs1[dy:dy + M, :], w1_ref[dy],
                        preferred_element_type=jnp.float32)
    # rmask zeroes the cross-image bleed rows so they become the zero conv2 halos.
    h = jnp.maximum(acc1 + b1_ref[...], 0.0) * rmask_ref[...]   # (M, Wu*C_out) f32
    pad2_ref[1:M + 1, :] = h

    # ---- BasicConv 2: Conv3x3 (BN folded into weights) + bias + ReLU ----
    lhs2 = pad2_ref[...].astype(jnp.bfloat16)
    acc2 = jnp.dot(lhs2[0:M, :], w2_ref[0], preferred_element_type=jnp.float32)
    for dy in range(1, 3):
        acc2 += jnp.dot(lhs2[dy:dy + M, :], w2_ref[dy],
                        preferred_element_type=jnp.float32)
    y = jnp.maximum(acc2 + b2_ref[...], 0.0)
    for n in range(n_blk):                                      # lane-dense 128 stores
        out_ref[n * Hu:(n + 1) * Hu, :] = y[n * P:n * P + Hu, :]


# ---------------- host-side weight preparation (one-time) ----------------
def _banded_weights(w, W_cols):
    """(3,3,Cin,Cout) conv weights -> (3, W_cols*Cin, W_cols*Cout) banded matrices.

    band[dy][c*Cin+ci, j*Cout+co] = w[dy, c-j+1, ci, co] for |c-j| <= 1, so the 3x3
    conv along W (including zero padding) is one matmul per kernel row dy applied to
    lane-packed (rows, W*C) activations.
    """
    kh, kw, Cin, Cout = w.shape
    band = np.zeros((kh, W_cols * Cin, W_cols * Cout), dtype=np.float32)
    for dy in range(kh):
        for dx in range(kw):
            for j in range(W_cols):
                c = j + dx - 1
                if 0 <= c < W_cols:
                    band[dy, c * Cin:(c + 1) * Cin, j * Cout:(j + 1) * Cout] = w[dy, dx]
    return band


def _banded_weights_ssplit(w, Wu):
    """Conv1 band whose K rows expect the [even-W block | odd-W block] LHS layout
    produced by the in-kernel unpool (folds the 2x W-duplication into the weights)."""
    kh, kw, Cin, Cout = w.shape
    Wp = Wu // 2
    band = np.zeros((kh, Wu * Cin, Wu * Cout), dtype=np.float32)
    for dy in range(kh):
        for dx in range(kw):
            for j in range(Wu):
                c = j + dx - 1                      # unpooled input column
                if 0 <= c < Wu:
                    s, wp = c % 2, c // 2
                    r0 = (s * Wp + wp) * Cin
                    band[dy, r0:r0 + Cin, j * Cout:(j + 1) * Cout] = w[dy, dx]
    return band


def prepare_params(params, Wu):
    """Fold BN scale into conv weights and build banded bf16 weight matrices.

    Note: BN scale is folded before the bf16 cast; if accuracy is tight keep the
    scale as an f32 epilogue multiply instead.
    """
    w1, s1, b1, w2, s2, b2 = [np.asarray(p, np.float32) for p in params]
    c_in, c_out = w1.shape[2], w1.shape[3]
    # VMEM guard: banded weights are (Wu*C)^2 bf16 per dy and double-buffered by the
    # BlockSpec.  For large Wu*C (real SegNet sizes) fall back to 9x K=C dots or tile
    # the band along W — v7x (64 MiB VMEM) hits the wall at half the size of v5e/v6e.
    band_bytes = 2 * 3 * ((Wu * c_in) * (Wu * c_out) + (Wu * c_out) ** 2)
    assert band_bytes < 8 * 1024 * 1024, (
        "banded weights too large for this kernel formulation; tile the band along W "
        "or use the 9x K=C_in dot formulation")

    w1f = w1 * s1.reshape(1, 1, 1, -1)              # BN scale folded into weights
    w2f = w2 * s2.reshape(1, 1, 1, -1)
    W1 = jnp.asarray(_banded_weights_ssplit(w1f, Wu), jnp.bfloat16)
    W2 = jnp.asarray(_banded_weights(w2f, Wu), jnp.bfloat16)
    b1p = jnp.asarray(np.tile(b1.reshape(-1), Wu)[None, :], jnp.float32)
    b2p = jnp.asarray(np.tile(b2.reshape(-1), Wu)[None, :], jnp.float32)
    return W1, b1p, W2, b2p


def _choose_n_blk(N, cap=8):
    """Images stacked along M per grid step; keep >= 2 grid steps when N >= 2 so both
    v7x TensorCores get work.  Capped to bound VMEM/register growth for big batches."""
    best = 1
    for cand in range(1, min(N // 2, cap) + 1):
        if N % cand == 0:
            best = cand
    return best


@functools.partial(jax.jit, static_argnames=("out_size",))
def decoder_forward(x, indices, out_size, packed_params):
    """x, indices: (N, C_in, Hp, Wp) NCHW (indices int32). out_size: (N, C_in, Hu, Wu)."""
    W1, b1p, W2, b2p = packed_params
    N, C_in, Hp, Wp = x.shape
    Hu, Wu = out_size[2], out_size[3]
    assert Hu == 2 * Hp and Wu == 2 * Wp
    C_out = W2.shape[2] // Wu

    n_blk = _choose_n_blk(N)
    if (n_blk * Hu) % 8 != 0:        # block rows must be sublane-aligned (or full)
        n_blk = N
    n_steps = N // n_blk
    P = Hu + 2
    M = n_blk * P - 2

    # NCHW -> lane-packed (N*Hu, Wp*C_in), rows pre-duplicated for the unpool.
    # TODO(synk): if the surrounding network already runs NHWC / lane-packed, these
    # transposes (and the inverse reshape/transpose on the output) disappear.
    def pack(a, dtype):
        a = jnp.transpose(a, (0, 2, 3, 1)).astype(dtype)     # (N, Hp, Wp, C)
        a = a.reshape(N, Hp, Wp * C_in)
        a = jnp.repeat(a, 2, axis=1)                         # (N, Hu, Wp*C)
        return a.reshape(N * Hu, Wp * C_in)

    x_p = pack(x, jnp.float32)
    idx_p = pack(indices, jnp.int32)

    # Grid-invariant constants (hoisted out of the kernel; baked at trace time).
    wp_idx = np.arange(Wp * C_in, dtype=np.int64) // C_in
    h_idx = np.tile(np.arange(Hu, dtype=np.int64), n_blk)
    lin0 = jnp.asarray(h_idx[:, None] * Wu + 2 * wp_idx[None, :], jnp.int32)
    rmask = jnp.asarray(((np.arange(M) % P) < Hu).astype(np.float32)[:, None],
                        jnp.float32)

    kernel = functools.partial(_decoder_kernel, n_blk=n_blk, Hu=Hu)

    out2d = pl.pallas_call(
        kernel,
        out_shape=jax.ShapeDtypeStruct((N * Hu, Wu * C_out), jnp.float32),
        grid=(n_steps,),
        in_specs=[
            pl.BlockSpec((n_blk * Hu, Wp * C_in), lambda b: (b, 0)),      # x (packed)
            pl.BlockSpec((n_blk * Hu, Wp * C_in), lambda b: (b, 0)),      # indices
            pl.BlockSpec((n_blk * Hu, Wp * C_in), lambda b: (0, 0)),      # lin0
            pl.BlockSpec((M, 1), lambda b: (0, 0)),                       # row mask
            pl.BlockSpec((3, Wu * C_in, Wu * C_out), lambda b: (0, 0, 0)),   # W1 band
            pl.BlockSpec((1, Wu * C_out), lambda b: (0, 0)),                 # b1
            pl.BlockSpec((3, Wu * C_out, Wu * C_out), lambda b: (0, 0, 0)),  # W2 band
            pl.BlockSpec((1, Wu * C_out), lambda b: (0, 0)),                 # b2
        ],
        out_specs=pl.BlockSpec((n_blk * Hu, Wu * C_out), lambda b: (b, 0)),
        scratch_shapes=[
            pltpu.VMEM((n_blk * P, Wu * C_in), jnp.float32),
            pltpu.VMEM((n_blk * P, Wu * C_out), jnp.float32),
        ],
        compiler_params=pltpu.CompilerParams(dimension_semantics=("parallel",)),
    )(x_p, idx_p, lin0, rmask, W1, b1p, W2, b2p)

    out = out2d.reshape(N, Hu, Wu, C_out)
    return jnp.transpose(out, (0, 3, 1, 2))


# ---------------- pure-JAX reference (for correctness check only) ----------------
def reference_forward(x, indices, out_size, params):
    w1, s1, b1, w2, s2, b2 = params
    N, C, Hp, Wp = x.shape
    Hu, Wu = out_size[2], out_size[3]
    x_up = jnp.repeat(jnp.repeat(x, 2, axis=2), 2, axis=3)
    i_up = jnp.repeat(jnp.repeat(indices, 2, axis=2), 2, axis=3)
    lin = (jnp.arange(Hu)[:, None] * Wu + jnp.arange(Wu)[None, :]).astype(jnp.int32)
    u = jnp.where(i_up == lin[None, None], x_up, 0.0)

    def block(h, w, scale, bias):
        y = jax.lax.conv_general_dilated(
            h, w, window_strides=(1, 1), padding=((1, 1), (1, 1)),
            dimension_numbers=("NCHW", "HWIO", "NCHW"),
            precision=jax.lax.Precision.HIGHEST)
        y = y * scale.reshape(1, -1, 1, 1) + bias.reshape(1, -1, 1, 1)
        return jnp.maximum(y, 0.0)

    h = block(u, w1, s1[0], b1[0])
    return block(h, w2, s2[0], b2[0])


def init_params(key, c_in, c_out):
    ks = jax.random.split(key, 10)

    def bn_fold(kg, kb, km, kv):
        gamma = 1.0 + 0.1 * jax.random.normal(kg, (c_out,), jnp.float32)
        beta = 0.1 * jax.random.normal(kb, (c_out,), jnp.float32)
        mean = 0.1 * jax.random.normal(km, (c_out,), jnp.float32)
        var = jnp.abs(1.0 + 0.1 * jax.random.normal(kv, (c_out,), jnp.float32))
        scale = gamma / jnp.sqrt(var + EPS)
        bias = beta - mean * scale
        return scale.reshape(1, c_out), bias.reshape(1, c_out)

    w1 = 0.1 * jax.random.normal(ks[0], (3, 3, c_in, c_out), jnp.float32)
    s1, b1 = bn_fold(ks[1], ks[2], ks[3], ks[4])
    w2 = 0.1 * jax.random.normal(ks[5], (3, 3, c_out, c_out), jnp.float32)
    s2, b2 = bn_fold(ks[6], ks[7], ks[8], ks[9])
    return (w1, s1, b1, w2, s2, b2)


if __name__ == "__main__":
    # Pooled input (N, C_in, 8, 8), unpool output size (N, C_in, 16, 16),
    # n_in_feat=4 -> n_out_feat=8 (Wu*C_out = 128: one full lane tile).
    # N=4 with n_blk=2 exercises batch-stacking while keeping 2 parallel grid steps.
    N, C_in, C_out, Hp, Wp = 4, 4, 8, 8, 8
    Hu, Wu = 2 * Hp, 2 * Wp
    out_size = (N, C_in, Hu, Wu)

    key = jax.random.PRNGKey(0)
    k_params, k_x, k_r, k_c = jax.random.split(key, 4)

    params = init_params(k_params, C_in, C_out)
    x = jax.random.normal(k_x, (N, C_in, Hp, Wp), jnp.float32)

    # Synthesize valid max_pool2d(kernel=2, stride=2) argmax indices: each pooled
    # element points to one position inside its own 2x2 window of the unpooled grid.
    r = jax.random.randint(k_r, (N, C_in, Hp, Wp), 0, 2)
    c = jax.random.randint(k_c, (N, C_in, Hp, Wp), 0, 2)
    ii = jnp.arange(Hp).reshape(1, 1, Hp, 1)
    jj = jnp.arange(Wp).reshape(1, 1, 1, Wp)
    indices = ((2 * ii + r) * Wu + (2 * jj + c)).astype(jnp.int32)

    packed = prepare_params(params, Wu)
    out = decoder_forward(x, indices, out_size, packed)
    out = jax.block_until_ready(out)

    ref = reference_forward(x, indices, out_size, params)
    assert out.shape == (N, C_out, Hu, Wu)
    # bf16 MXU inputs (f32 accumulation/epilogue) -> slightly looser tolerance than f32.
    assert jnp.allclose(out, ref, rtol=2e-2, atol=2e-2), "mismatch vs JAX reference"

    print("KERNEL_OK")
</pallas_src>

<mosaic_0001>
module attributes {stable_mosaic.version = 11 : i64} {
  func.func @_decoder_kernel(%arg0: i32, %arg1: memref<32x32xf32, #tpu.memory_space<vmem>>, %arg2: memref<32x32xi32, #tpu.memory_space<vmem>>, %arg3: memref<32x32xi32, #tpu.memory_space<vmem>>, %arg4: memref<34x1xf32, #tpu.memory_space<vmem>>, %arg5: memref<3x64x128xbf16, #tpu.memory_space<vmem>>, %arg6: memref<1x128xf32, #tpu.memory_space<vmem>>, %arg7: memref<3x128x128xbf16, #tpu.memory_space<vmem>>, %arg8: memref<1x128xf32, #tpu.memory_space<vmem>>, %arg9: memref<32x128xf32, #tpu.memory_space<vmem>>, %arg10: memref<36x64xf32, #tpu.memory_space<vmem>>, %arg11: memref<36x128xf32, #tpu.memory_space<vmem>>) attributes {dimension_semantics = [#tpu.dimension_semantics<parallel>], iteration_bounds = array<i64: 2>, scalar_prefetch = 0 : i64, scratch_operands = 2 : i64, tpu.core_type = #tpu.core_type<tc>, window_params = [{transform_indices = @transform_0, window_bounds = array<i64: 32, 32>}, {transform_indices = @transform_1, window_bounds = array<i64: 32, 32>}, {pipeline_mode = #tpu.pipeline_mode<synchronous>, transform_indices = @transform_2, window_bounds = array<i64: 32, 32>}, {pipeline_mode = #tpu.pipeline_mode<synchronous>, transform_indices = @transform_3, window_bounds = array<i64: 34, 1>}, {pipeline_mode = #tpu.pipeline_mode<synchronous>, transform_indices = @transform_4, window_bounds = array<i64: 3, 64, 128>}, {pipeline_mode = #tpu.pipeline_mode<synchronous>, transform_indices = @transform_5, window_bounds = array<i64: 1, 128>}, {pipeline_mode = #tpu.pipeline_mode<synchronous>, transform_indices = @transform_6, window_bounds = array<i64: 3, 128, 128>}, {pipeline_mode = #tpu.pipeline_mode<synchronous>, transform_indices = @transform_7, window_bounds = array<i64: 1, 128>}, {transform_indices = @transform_8, window_bounds = array<i64: 32, 128>}]} {
    %cst = arith.constant 0.000000e+00 : f32
    %0 = vector.broadcast %cst : f32 to vector<36x64xf32>
    %c0 = arith.constant 0 : index
    %c0_0 = arith.constant 0 : index
    %1 = vector.load %arg10[%c0, %c0_0] : memref<36x64xf32, #tpu.memory_space<vmem>>, vector<36x64xf32>
    tpu.vector_store %arg10[%c0, %c0_0], %0 {strides = array<i32>} : memref<36x64xf32, #tpu.memory_space<vmem>>, vector<36x64xf32>,
    %cst_1 = arith.constant 0.000000e+00 : f32
    %2 = vector.broadcast %cst_1 : f32 to vector<36x128xf32>
    %c0_2 = arith.constant 0 : index
    %c0_3 = arith.constant 0 : index
    %3 = vector.load %arg11[%c0_2, %c0_3] : memref<36x128xf32, #tpu.memory_space<vmem>>, vector<36x128xf32>
    tpu.vector_store %arg11[%c0_2, %c0_3], %2 {strides = array<i32>} : memref<36x128xf32, #tpu.memory_space<vmem>>, vector<36x128xf32>,
    %c0_4 = arith.constant 0 : index
    %c0_5 = arith.constant 0 : index
    %4 = vector.load %arg2[%c0_4, %c0_5] : memref<32x32xi32, #tpu.memory_space<vmem>>, vector<32x32xi32>
    %c0_6 = arith.constant 0 : index
    %c0_7 = arith.constant 0 : index
    %5 = vector.load %arg3[%c0_6, %c0_7] : memref<32x32xi32, #tpu.memory_space<vmem>>, vector<32x32xi32>
    %6 = arith.subi %4, %5 : vector<32x32xi32>
    %c0_8 = arith.constant 0 : index
    %c0_9 = arith.constant 0 : index
    %7 = vector.load %arg1[%c0_8, %c0_9] : memref<32x32xf32, #tpu.memory_space<vmem>>, vector<32x32xf32>
    %c0_i32 = arith.constant 0 : i32
    %8 = vector.broadcast %c0_i32 : i32 to vector<32x32xi32>
    %9 = arith.cmpi eq, %6, %8 : vector<32x32xi32>
    %cst_10 = arith.constant 0.000000e+00 : f32
    %10 = vector.broadcast %cst_10 : f32 to vector<32x32xf32>
    %11 = arith.select %9, %7, %10 : vector<32x32xi1>, vector<32x32xf32>
    %c1_i32 = arith.constant 1 : i32
    %12 = vector.broadcast %c1_i32 : i32 to vector<32x32xi32>
    %13 = arith.cmpi eq, %6, %12 : vector<32x32xi32>
    %cst_11 = arith.constant 0.000000e+00 : f32
    %14 = vector.broadcast %cst_11 : f32 to vector<32x32xf32>
    %15 = arith.select %13, %7, %14 : vector<32x32xi1>, vector<32x32xf32>
    %16 = tpu.concatenate %11, %15 in 1 : vector<32x32xf32>, vector<32x32xf32> -> vector<32x64xf32>
    %17 = vector.extract_strided_slice %16 {offsets = [0, 0], sizes = [16, 64], strides = [1, 1]} : vector<32x64xf32> to vector<16x64xf32>
    %c1 = arith.constant 1 : index
    %c0_12 = arith.constant 0 : index
    %18 = vector.load %arg10[%c1, %c0_12] : memref<36x64xf32, #tpu.memory_space<vmem>>, vector<16x64xf32>
    tpu.vector_store %arg10[%c1, %c0_12], %17 {strides = array<i32>} : memref<36x64xf32, #tpu.memory_space<vmem>>, vector<16x64xf32>,
    %19 = vector.extract_strided_slice %16 {offsets = [16, 0], sizes = [16, 64], strides = [1, 1]} : vector<32x64xf32> to vector<16x64xf32>
    %c19 = arith.constant 19 : index
    %c0_13 = arith.constant 0 : index
    %20 = vector.load %arg10[%c19, %c0_13] : memref<36x64xf32, #tpu.memory_space<vmem>>, vector<16x64xf32>
    tpu.vector_store %arg10[%c19, %c0_13], %19 {strides = array<i32>} : memref<36x64xf32, #tpu.memory_space<vmem>>, vector<16x64xf32>,
    %c0_14 = arith.constant 0 : index
    %c0_15 = arith.constant 0 : index
    %21 = vector.load %arg10[%c0_14, %c0_15] : memref<36x64xf32, #tpu.memory_space<vmem>>, vector<36x64xf32>
    %22 = arith.truncf %21 : vector<36x64xf32> to vector<36x64xbf16>
    %23 = vector.extract_strided_slice %22 {offsets = [0, 0], sizes = [34, 64], strides = [1, 1]} : vector<36x64xbf16> to vector<34x64xbf16>
    %c0_16 = arith.constant 0 : index
    %c0_17 = arith.constant 0 : index
    %c0_18 = arith.constant 0 : index
    %24 = vector.load %arg5[%c0_16, %c0_17, %c0_18] : memref<3x64x128xbf16, #tpu.memory_space<vmem>>, vector<1x64x128xbf16>
    %25 = vector.shape_cast %24 : vector<1x64x128xbf16> to vector<64x128xbf16>
    %cst_19 = arith.constant dense<0.000000e+00> : vector<34x128xf32>
    %26 = tpu.matmul %23, %25, %cst_19 {dimension_numbers = #tpu.dot_dimension_numbers<[1], [0], [0], [1], [0, 0, 1, 1], [], []>} : vector<34x64xbf16>, vector<64x128xbf16>, vector<34x128xf32> -> vector<34x128xf32>
    %27 = vector.extract_strided_slice %22 {offsets = [1, 0], sizes = [34, 64], strides = [1, 1]} : vector<36x64xbf16> to vector<34x64xbf16>
    %c1_20 = arith.constant 1 : index
    %c0_21 = arith.constant 0 : index
    %c0_22 = arith.constant 0 : index
    %28 = vector.load %arg5[%c1_20, %c0_21, %c0_22] : memref<3x64x128xbf16, #tpu.memory_space<vmem>>, vector<1x64x128xbf16>
    %29 = vector.shape_cast %28 : vector<1x64x128xbf16> to vector<64x128xbf16>
    %cst_23 = arith.constant dense<0.000000e+00> : vector<34x128xf32>
    %30 = tpu.matmul %27, %29, %cst_23 {dimension_numbers = #tpu.dot_dimension_numbers<[1], [0], [0], [1], [0, 0, 1, 1], [], []>} : vector<34x64xbf16>, vector<64x128xbf16>, vector<34x128xf32> -> vector<34x128xf32>
    %31 = arith.addf %26, %30 : vector<34x128xf32>
    %32 = vector.extract_strided_slice %22 {offsets = [2, 0], sizes = [34, 64], strides = [1, 1]} : vector<36x64xbf16> to vector<34x64xbf16>
    %c2 = arith.constant 2 : index
    %c0_24 = arith.constant 0 : index
    %c0_25 = arith.constant 0 : index
    %33 = vector.load %arg5[%c2, %c0_24, %c0_25] : memref<3x64x128xbf16, #tpu.memory_space<vmem>>, vector<1x64x128xbf16>
    %34 = vector.shape_cast %33 : vector<1x64x128xbf16> to vector<64x128xbf16>
    %cst_26 = arith.constant dense<0.000000e+00> : vector<34x128xf32>
    %35 = tpu.matmul %32, %34, %cst_26 {dimension_numbers = #tpu.dot_dimension_numbers<[1], [0], [0], [1], [0, 0, 1, 1], [], []>} : vector<34x64xbf16>, vector<64x128xbf16>, vector<34x128xf32> -> vector<34x128xf32>
    %36 = arith.addf %31, %35 : vector<34x128xf32>
    %c0_27 = arith.constant 0 : index
    %c0_28 = arith.constant 0 : index
    %37 = vector.load %arg6[%c0_27, %c0_28] : memref<1x128xf32, #tpu.memory_space<vmem>>, vector<1x128xf32>
    %38 = vector.broadcast %37 : vector<1x128xf32> to vector<34x128xf32>
    %39 = arith.addf %36, %38 : vector<34x128xf32>
    %cst_29 = arith.constant 0.000000e+00 : f32
    %40 = vector.broadcast %cst_29 : f32 to vector<34x128xf32>
    %41 = arith.maximumf %39, %40 : vector<34x128xf32>
    %c0_30 = arith.constant 0 : index
    %c0_31 = arith.constant 0 : index
    %42 = vector.load %arg4[%c0_30, %c0_31] : memref<34x1xf32, #tpu.memory_space<vmem>>, vector<34x1xf32>
    %43 = vector.broadcast %42 : vector<34x1xf32> to vector<34x128xf32>
    %44 = arith.mulf %41, %43 : vector<34x128xf32>
    %c1_32 = arith.constant 1 : index
    %c0_33 = arith.constant 0 : index
    %45 = vector.load %arg11[%c1_32, %c0_33] : memref<36x128xf32, #tpu.memory_space<vmem>>, vector<34x128xf32>
    tpu.vector_store %arg11[%c1_32, %c0_33], %44 {strides = array<i32>} : memref<36x128xf32, #tpu.memory_space<vmem>>, vector<34x128xf32>,
    %c0_34 = arith.constant 0 : index
    %c0_35 = arith.constant 0 : index
    %46 = vector.load %arg11[%c0_34, %c0_35] : memref<36x128xf32, #tpu.memory_space<vmem>>, vector<36x128xf32>
    %47 = arith.truncf %46 : vector<36x128xf32> to vector<36x128xbf16>
    %48 = vector.extract_strided_slice %47 {offsets = [0, 0], sizes = [34, 128], strides = [1, 1]} : vector<36x128xbf16> to vector<34x128xbf16>
    %c0_36 = arith.constant 0 : index
    %c0_37 = arith.constant 0 : index
    %c0_38 = arith.constant 0 : index
    %49 = vector.load %arg7[%c0_36, %c0_37, %c0_38] : memref<3x128x128xbf16, #tpu.memory_space<vmem>>, vector<1x128x128xbf16>
    %50 = vector.shape_cast %49 : vector<1x128x128xbf16> to vector<128x128xbf16>
    %cst_39 = arith.constant dense<0.000000e+00> : vector<34x128xf32>
    %51 = tpu.matmul %48, %50, %cst_39 {dimension_numbers = #tpu.dot_dimension_numbers<[1], [0], [0], [1], [0, 0, 1, 1], [], []>} : vector<34x128xbf16>, vector<128x128xbf16>, vector<34x128xf32> -> vector<34x128xf32>
    %52 = vector.extract_strided_slice %47 {offsets = [1, 0], sizes = [34, 128], strides = [1, 1]} : vector<36x128xbf16> to vector<34x128xbf16>
    %c1_40 = arith.constant 1 : index
    %c0_41 = arith.constant 0 : index
    %c0_42 = arith.constant 0 : index
    %53 = vector.load %arg7[%c1_40, %c0_41, %c0_42] : memref<3x128x128xbf16, #tpu.memory_space<vmem>>, vector<1x128x128xbf16>
    %54 = vector.shape_cast %53 : vector<1x128x128xbf16> to vector<128x128xbf16>
    %cst_43 = arith.constant dense<0.000000e+00> : vector<34x128xf32>
    %55 = tpu.matmul %52, %54, %cst_43 {dimension_numbers = #tpu.dot_dimension_numbers<[1], [0], [0], [1], [0, 0, 1, 1], [], []>} : vector<34x128xbf16>, vector<128x128xbf16>, vector<34x128xf32> -> vector<34x128xf32>
    %56 = arith.addf %51, %55 : vector<34x128xf32>
    %57 = vector.extract_strided_slice %47 {offsets = [2, 0], sizes = [34, 128], strides = [1, 1]} : vector<36x128xbf16> to vector<34x128xbf16>
    %c2_44 = arith.constant 2 : index
    %c0_45 = arith.constant 0 : index
    %c0_46 = arith.constant 0 : index
    %58 = vector.load %arg7[%c2_44, %c0_45, %c0_46] : memref<3x128x128xbf16, #tpu.memory_space<vmem>>, vector<1x128x128xbf16>
    %59 = vector.shape_cast %58 : vector<1x128x128xbf16> to vector<128x128xbf16>
    %cst_47 = arith.constant dense<0.000000e+00> : vector<34x128xf32>
    %60 = tpu.matmul %57, %59, %cst_47 {dimension_numbers = #tpu.dot_dimension_numbers<[1], [0], [0], [1], [0, 0, 1, 1], [], []>} : vector<34x128xbf16>, vector<128x128xbf16>, vector<34x128xf32> -> vector<34x128xf32>
    %61 = arith.addf %56, %60 : vector<34x128xf32>
    %c0_48 = arith.constant 0 : index
    %c0_49 = arith.constant 0 : index
    %62 = vector.load %arg8[%c0_48, %c0_49] : memref<1x128xf32, #tpu.memory_space<vmem>>, vector<1x128xf32>
    %63 = vector.broadcast %62 : vector<1x128xf32> to vector<34x128xf32>
    %64 = arith.addf %61, %63 : vector<34x128xf32>
    %cst_50 = arith.constant 0.000000e+00 : f32
    %65 = vector.broadcast %cst_50 : f32 to vector<34x128xf32>
    %66 = arith.maximumf %64, %65 : vector<34x128xf32>
    %67 = vector.extract_strided_slice %66 {offsets = [0, 0], sizes = [16, 128], strides = [1, 1]} : vector<34x128xf32> to vector<16x128xf32>
    %c0_51 = arith.constant 0 : index
    %c0_52 = arith.constant 0 : index
    %68 = vector.load %arg9[%c0_51, %c0_52] : memref<32x128xf32, #tpu.memory_space<vmem>>, vector<16x128xf32>
    tpu.vector_store %arg9[%c0_51, %c0_52], %67 {strides = array<i32>} : memref<32x128xf32, #tpu.memory_space<vmem>>, vector<16x128xf32>,
    %69 = vector.extract_strided_slice %66 {offsets = [18, 0], sizes = [16, 128], strides = [1, 1]} : vector<34x128xf32> to vector<16x128xf32>
    %c16 = arith.constant 16 : index
    %c0_53 = arith.constant 0 : index
    %70 = vector.load %arg9[%c16, %c0_53] : memref<32x128xf32, #tpu.memory_space<vmem>>, vector<16x128xf32>
    tpu.vector_store %arg9[%c16, %c0_53], %69 {strides = array<i32>} : memref<32x128xf32, #tpu.memory_space<vmem>>, vector<16x128xf32>,
    return
  }
  func.func @transform_0(%arg0: i32) -> (i32, i32) {
    %c0_i32 = arith.constant 0 : i32
    %c0_i32_0 = arith.constant 0 : i32
    return %arg0, %c0_i32 : i32, i32
  }
  func.func @transform_1(%arg0: i32) -> (i32, i32) {
    %c0_i32 = arith.constant 0 : i32
    %c0_i32_0 = arith.constant 0 : i32
    return %arg0, %c0_i32 : i32, i32
  }
  func.func @transform_2(%arg0: i32) -> (i32, i32) {
    %c0_i32 = arith.constant 0 : i32
    %c0_i32_0 = arith.constant 0 : i32
    %c0_i32_1 = arith.constant 0 : i32
    return %c0_i32, %c0_i32_0 : i32, i32
  }
  func.func @transform_3(%arg0: i32) -> (i32, i32) {
    %c0_i32 = arith.constant 0 : i32
    %c0_i32_0 = arith.constant 0 : i32
    %c0_i32_1 = arith.constant 0 : i32
    return %c0_i32, %c0_i32_0 : i32, i32
  }
  func.func @transform_4(%arg0: i32) -> (i32, i32, i32) {
    %c0_i32 = arith.constant 0 : i32
    %c0_i32_0 = arith.constant 0 : i32
    %c0_i32_1 = arith.constant 0 : i32
    %c0_i32_2 = arith.constant 0 : i32
    return %c0_i32, %c0_i32_0, %c0_i32_1 : i32, i32, i32
  }
  func.func @transform_5(%arg0: i32) -> (i32, i32) {
    %c0_i32 = arith.constant 0 : i32
    %c0_i32_0 = arith.constant 0 : i32
    %c0_i32_1 = arith.constant 0 : i32
    return %c0_i32, %c0_i32_0 : i32, i32
  }
  func.func @transform_6(%arg0: i32) -> (i32, i32, i32) {
    %c0_i32 = arith.constant 0 : i32
    %c0_i32_0 = arith.constant 0 : i32
    %c0_i32_1 = arith.constant 0 : i32
    %c0_i32_2 = arith.constant 0 : i32
    return %c0_i32, %c0_i32_0, %c0_i32_1 : i32, i32, i32
  }
  func.func @transform_7(%arg0: i32) -> (i32, i32) {
    %c0_i32 = arith.constant 0 : i32
    %c0_i32_0 = arith.constant 0 : i32
    %c0_i32_1 = arith.constant 0 : i32
    return %c0_i32, %c0_i32_0 : i32, i32
  }
  func.func @transform_8(%arg0: i32) -> (i32, i32) {
    %c0_i32 = arith.constant 0 : i32
    %c0_i32_0 = arith.constant 0 : i32
    return %arg0, %c0_i32 : i32, i32
  }
}

</mosaic_0001>

<bundles_post_ra>
// kernel: decoder_forward.1
= control target key start
LH: loop header
LB: loop body
LE: loop exit
PB: predicated region body
PF: predicated region fallthrough
CT: control target
= control target key end

     0   :  { %s1449_s27 = smov 0   ;;  %s1672_s0 = inlined_call_operand.vmem [shape: f32[64,32], index: 0, kind: input, shape index: {}]   ;;  %s1673_s1 = inlined_call_operand.vmem [shape: s32[64,32], index: 1, kind: input, shape index: {}]   ;;  %s1674_s2 = inlined_call_operand.vmem [shape: s32[32,32], index: 2, kind: input, shape index: {}]   ;;  %s1675_s3 = inlined_call_operand.vmem [shape: f32[34,1], index: 3, kind: input, shape index: {}]   ;;  %s1676_s4 = inlined_call_operand.vmem [shape: bf16[3,64,128], index: 4, kind: input, shape index: {}]   ;;  %s1677_s5 = inlined_call_operand.vmem [shape: f32[1,128], index: 5, kind: input, shape index: {}]   ;;  %s1678_s6 = inlined_call_operand.vmem [shape: bf16[3,128,128], index: 6, kind: input, shape index: {}]   ;;  %s1679_s7 = inlined_call_operand.vmem [shape: f32[1,128], index: 7, kind: input, shape index: {}]   ;;  %s1680_s8 = inlined_call_operand.vmem [shape: f32[64,128], index: 8, kind: output, shape index: {}]  }
   0x1 LB: > { %s1119_s28 = sadd.s32 4294967295, %s1399_s27   ;;  %p1123_p0 = scmp.ge.s32.totalorder %s1399_s27, 1  ;;  %s1399_s27 = sphi %s1449_s27, %s18_s27  }
   0x2   : > { %p274_p1 = scmp.lt.s32.totalorder %s1399_s27, 3 }
   0x4   : > { %p275_p2 = pnand %p1123_p0, %p274_p1 }
   0x5   : > { %s1124_s29 = sshll.u32 (!%p275_p2), %s1119_s28, 2  ;;  %s1402_s23 = smov (!%p275_p2), 32  }
   0x6   : > { %278 = sbr.rel (%p275_p2) target bundleno = 543 (0x21f), region = 52  ;;  %p314_p3 = scmp.lt.s32.totalorder (!%p275_p2), %s1124_s29, 7 }
   0xb   : > { %vm332_vm0 = vcmask 523264   ;;  %vm337_vm1 = vcmask 519168   ;;  %v1401_v0 = vmov 0.0   ;;  %s1682_s29 = smov (!%p314_p3, %s1124_s29), 7  ;;  %v351_v1 = vld [vmem:[%s1674_s2 + $0x18] sm:$0xff]  ;;  %v349_v2 = vld [vmem:[%s1674_s2 + $0x8] sm:$0xff] }
   0xc   : > { %336 = vst.msk [vmem:[#allocation2 + $0x18] sm:$0xff] %vm332_vm0, %v1401_v0  ;;  %s1459_s30 = sshll.u32 %s1682_s29, 3  ;;  %v350_v3 = vld [vmem:[%s1674_s2 + $0x10] sm:$0xff]  ;;  %v348_v13 = vld [vmem:[%s1674_s2] sm:$0xff]  ;;  %v1340_v25 = vld [vmem:[%s1676_s4 + $0x38] sm:$0xff]  ;;  %vm392_vm10 = vcmask 261120  }
   0xd   : > { %338 = vst.msk [vmem:[#allocation2 + $0x20] sm:$0xf] %vm337_vm1, %v1401_v0  ;;  %s1472_s15 = scalar_lea.vmem %s1672_s0, %s1459_s30  ;;  %s323_s18 = scalar_lea.vmem %s1673_s1, %s1459_s30  ;;  %1369 = vmatpush.bf16.msra.mxu2 %v1340_v25  ;;  %502 = vmatpush.bf16.msra.mxu0 %v1340_v25  ;;  %v1336_v26 = vld [vmem:[%s1676_s4 + $0x18] sm:$0xff]  ;;  %v1339_v27 = vld [vmem:[%s1676_s4 + $0x30] sm:$0xff]  ;;  %v1338_v29 = vld [vmem:[%s1676_s4 + $0x28] sm:$0xff]  ;;  %vm583_vm12 = vcmask 1046528  }
   0xe   : > { %333 = vst.msk [vmem:[#allocation2] sm:$0xff] %vm332_vm0, %v1401_v0  ;;  %v347_v4 = vld [vmem:[%s323_s18 + $0x18] sm:$0xff]  ;;  %v345_v5 = vld [vmem:[%s323_s18 + $0x8] sm:$0xff]  ;;  %v346_v10 = vld [vmem:[%s323_s18 + $0x10] sm:$0xff]  ;;  %555 = vmatpush.bf16.msra.mxu1 %v1336_v26  ;;  %vm441_vm11 = vsmask.f32 7424  ;;  %s1662_s12 = scalar_lea.vmem %s1680_s8, %s1459_s30 }
   0xf   : > { %334 = vst.msk [vmem:[#allocation2 + $0x8] sm:$0xff] %vm332_vm0, %v1401_v0  ;;  %v355_v6 = vsub.s32 %v347_v4, %v351_v1  ;;  %v359_v7 = vld [vmem:[%s1472_s15 + $0x18] sm:$0xff]  ;;  %v353_v8 = vsub.s32 %v345_v5, %v349_v2  ;;  %v357_v9 = vld [vmem:[%s1472_s15 + $0x8] sm:$0xff]  ;;  %v354_v11 = vsub.s32 %v346_v10, %v350_v3  ;;  %v344_v12 = vld [vmem:[%s323_s18] sm:$0xff] }
  0x10   : > { %335 = vst.msk [vmem:[#allocation2 + $0x10] sm:$0xff] %vm332_vm0, %v1401_v0  ;;  %v358_v18 = vld [vmem:[%s1472_s15 + $0x10] sm:$0xff]  ;;  %v352_v19 = vsub.s32 %v344_v12, %v348_v13  ;;  %v356_v21 = vld [vmem:[%s1472_s15] sm:$0xff]  ;;  %v1334_v30 = vld [vmem:[%s1676_s4 + $0x8] sm:$0xff] }
  0x11   : > { %339 = vst [vmem:[#allocation3] sm:$0xff] %v1401_v0  ;;  %vm363_vm2 = vcmp.eq.s32.totalorder %v355_v6, 0  ;;  %vm371_vm3 = vcmp.eq.s32.totalorder %v355_v6, 1  ;;  %vm361_vm4 = vcmp.eq.s32.totalorder %v353_v8, 0  ;;  %vm369_vm5 = vcmp.eq.s32.totalorder %v353_v8, 1  ;;  %v1335_v28 = vld [vmem:[%s1676_s4 + $0x10] sm:$0xff]  ;;  %1370 = vmatpush.bf16.msra.mxu2 %v1339_v27  ;;  %503 = vmatpush.bf16.msra.mxu0 %v1339_v27 }
  0x12   : > { %340 = vst [vmem:[#allocation3 + $0x8] sm:$0xff] %v1401_v0  ;;  %v375_v14 = vsel %vm371_vm3, %v359_v7, 0.0  ;;  %v367_v15 = vsel %vm363_vm2, %v359_v7, 0.0  ;;  %v373_v16 = vsel %vm369_vm5, %v357_v9, 0.0  ;;  %v365_v17 = vsel %vm361_vm4, %v357_v9, 0.0  ;;  %556 = vmatpush.bf16.msra.mxu1 %v1335_v28  ;;  %v1337_v31 = vld [vmem:[%s1676_s4 + $0x20] sm:$0xff] }
  0x13   : > { %341 = vst [vmem:[#allocation3 + $0x10] sm:$0xff] %v1401_v0  ;;  %386 = vrot.lane.b32.xlu0 %v375_v14, %s1402_s23  ;;  %382 = vrot.lane.b32.xlu1 %v373_v16, %s1402_s23  ;;  %vm362_vm6 = vcmp.eq.s32.totalorder %v354_v11, 0  ;;  %vm370_vm7 = vcmp.eq.s32.totalorder %v354_v11, 1  ;;  %vm360_vm8 = vcmp.eq.s32.totalorder %v352_v19, 0  ;;  %vm368_vm9 = vcmp.eq.s32.totalorder %v352_v19, 1  ;;  %v1333_v32 = vld [vmem:[%s1676_s4] sm:$0xff] }
  0x14   : > { %342 = vst [vmem:[#allocation3 + $0x18] sm:$0xff] %v1401_v0  ;;  %v366_v20 = vsel %vm362_vm6, %v358_v18, 0.0  ;;  %v364_v22 = vsel %vm360_vm8, %v356_v21, 0.0  ;;  %v374_v23 = vsel %vm370_vm7, %v358_v18, 0.0  ;;  %v372_v24 = vsel %vm368_vm9, %v356_v21, 0.0  ;;  %v1344_v56 = vld [vmem:[%s1676_s4 + $0x58] sm:$0xff] }
  0x15   : > { %343 = vst [vmem:[#allocation3 + $0x20] sm:$0xf] %v1401_v0  ;;  %1371 = vmatpush.bf16.msra.mxu2 %v1338_v29  ;;  %504 = vmatpush.bf16.msra.mxu0 %v1338_v29  ;;  %v1343_v0 = vld [vmem:[%s1676_s4 + $0x50] sm:$0xff]  ;;  %v1342_v5 = vld [vmem:[%s1676_s4 + $0x48] sm:$0xff]  ;;  %v1341_v9 = vld [vmem:[%s1676_s4 + $0x40] sm:$0xff]  ;;  %v1403_v18 = vmov 0  }
  0x16   : > { %557 = vmatpush.bf16.msra.mxu1 %v1334_v30  ;;  %v666_v16 = vld [vmem:[%s1675_s3 + $0x10] sm:$0xff]  ;;  %1389 = vset.pattern.permute.xlu0 %v1403_v18  ;;  %v667_v19 = vld [vmem:[%s1675_s3 + $0x18] sm:$0xff]  ;;  %v1350_v27 = vld [vmem:[%s1678_s6 + $0x28] sm:$0xff] }
  0x17   : > { %1388 = vset.pattern.permute.xlu2 %v1403_v18  ;;  %1390 = vset.pattern.permute.xlu1 %v1403_v18  ;;  %v1349_v29 = vld [vmem:[%s1678_s6 + $0x20] sm:$0xff] }
  0x19   : > { %1372 = vmatpush.bf16.msra.mxu2 %v1337_v31  ;;  %505 = vmatpush.bf16.msra.mxu0 %v1337_v31 }
  0x1a   : > { %558 = vmatpush.bf16.msra.mxu1 %v1333_v32 }
  0x1b   : > { %384 = vrot.lane.b32.xlu1 %v374_v23, %s1402_s23  ;;  %380 = vrot.lane.b32.xlu0 %v372_v24, %s1402_s23  ;;  %v668_v23 = vld [vmem:[%s1675_s3 + $0x20] sm:$0x3]  ;;  %v1352_v24 = vld [vmem:[%s1678_s6 + $0x38] sm:$0xff] }
  0x1d   : > { %1373 = vmatpush.bf16.msrb.mxu2 %v1336_v26  ;;  %908 = vmatpush.bf16.msrb.mxu0 %v1352_v24  ;;  %v1351_v26 = vld [vmem:[%s1678_s6 + $0x30] sm:$0xff] }
  0x21   : > { %1374 = vmatpush.bf16.msrb.mxu2 %v1335_v28  ;;  %909 = vmatpush.bf16.msrb.mxu0 %v1351_v26 }
  0x23   : > { %681 = vperm.xlu0 %1389, %v666_v16   ;;  %686 = vperm.xlu1 %1390, %v667_v19  }
  0x25   : > { %1375 = vmatpush.bf16.msrb.mxu2 %v1334_v30  ;;  %910 = vmatpush.bf16.msrb.mxu0 %v1350_v27  ;;  %v1348_v30 = vld [vmem:[%s1678_s6 + $0x18] sm:$0xff] }
  0x29   : > { %1376 = vmatpush.bf16.msrb.mxu2 %v1333_v32  ;;  %911 = vmatpush.bf16.msrb.mxu0 %v1349_v29  ;;  %v1368_v32 = vld [vmem:[%s1678_s6 + $0xb8] sm:$0xff] }
  0x2a   : > { %1004 = vmatpush.bf16.msrb.mxu1 %v1368_v32 }
  0x2d   : > { %912 = vmatpush.bf16.msrb.mxu0 %v1348_v30 }
  0x85   : > { %v387_v33 = vpop.permute.xlu0 %386  ;;  %v383_v34 = vpop.permute.xlu1 %382 }
  0x86   : > { %v396_v35 = vsel %vm392_vm10, %v367_v15, %v387_v33  ;;  %v394_v36 = vsel %vm392_vm10, %v365_v17, %v383_v34  ;;  %v664_v17 = vld [vmem:[%s1675_s3] sm:$0xff]  ;;  %v1347_v33 = vld [vmem:[%s1678_s6 + $0x10] sm:$0xff]  ;;  %v1360_v34 = vld [vmem:[%s1678_s6 + $0x78] sm:$0xff] }
  0x87   : > { %400 = vst.msk [vmem:[#allocation2 + $0x1b] sm:$0xff] %vm332_vm0, %v396_v35  ;;  %671 = vperm.xlu2 %1388, %v664_v17   ;;  %913 = vmatpush.bf16.msrb.mxu0 %v1347_v33 }
  0x88   : > { %398 = vst.msk [vmem:[#allocation2 + $0x9] sm:$0xff] %vm332_vm0, %v394_v36  ;;  %834 = vmatpush.bf16.msra.mxu3 %v1360_v34  ;;  %v1367_v36 = vld [vmem:[%s1678_s6 + $0xb0] sm:$0xff] }
  0x89   : > { %1005 = vmatpush.bf16.msrb.mxu1 %v1367_v36 }
  0x8d   : > { %v385_v37 = vpop.permute.xlu1 %384  ;;  %v381_v38 = vpop.permute.xlu0 %380 }
  0x8e   : > { %v395_v39 = vsel %vm392_vm10, %v366_v20, %v385_v37  ;;  %v393_v40 = vsel %vm392_vm10, %v364_v22, %v381_v38  ;;  %v405_v41 = vld [vmem:[#allocation2 + $0x20] sm:$0xf]  ;;  %v665_v20 = vld [vmem:[%s1675_s3 + $0x8] sm:$0xff] }
  0x8f   : > { %399 = vst.msk [vmem:[#allocation2 + $0x13] sm:$0xff] %vm332_vm0, %v395_v39  ;;  %v410_v42 = vpack.c.bf16 %v405_v41, %v405_v41  ;;  %676 = vperm.xlu2 %1388, %v665_v20   ;;  %v1346_v37 = vld [vmem:[%s1678_s6 + $0x8] sm:$0xff] }
  0x90   : > { %397 = vst.msk [vmem:[#allocation2 + $0x1] sm:$0xff] %vm332_vm0, %v393_v40  ;;  %v1359_v40 = vld [vmem:[%s1678_s6 + $0x70] sm:$0xff]  ;;  %914 = vmatpush.bf16.msrb.mxu0 %v1346_v37  ;;  %v1366_v41 = vld [vmem:[%s1678_s6 + $0xa8] sm:$0xff] }
  0x91   : > { %v437_v43 = vunpack.c.l.b16 %v410_v42  ;;  %835 = vmatpush.bf16.msra.mxu3 %v1359_v40  ;;  %v1345_v42 = vld [vmem:[%s1678_s6] sm:$0xff]  ;;  %1006 = vmatpush.bf16.msrb.mxu1 %v1366_v41 }
  0x93   : > { %v1517_v44 = vpack.c.b16 %v437_v43, %v437_v43  ;;  %v1358_v43 = vld [vmem:[%s1678_s6 + $0x68] sm:$0xff] }
  0x94   : > { %915 = vmatpush.bf16.msrb.mxu0 %v1345_v42 }
  0x95   : > { %v458_v45 = vshll.u32 %v1517_v44, 16  ;;  %v462_v49 = vshrl.u32 %v1517_v44, 16  ;;  %v587_v21 = vrot.slane %v1517_v44, 1  ;;  %836 = vmatpush.bf16.msra.mxu3 %v1358_v43  ;;  %v687_v29 = vpop.permute.xlu1 %686 }
  0x96   : > { %v403_v46 = vld [vmem:[#allocation2 + $0x10] sm:$0xff]  ;;  %v404_v47 = vld [vmem:[#allocation2 + $0x18] sm:$0xff] }
  0x97   : > { %v460_v48 = vrot.slane %v458_v45, 1  ;;  %v401_v50 = vld [vmem:[#allocation2] sm:$0xff]  ;;  %v402_v51 = vld [vmem:[#allocation2 + $0x8] sm:$0xff]  ;;  %v408_v52 = vpack.c.bf16 %v403_v46, %v403_v46  ;;  %v409_v53 = vpack.c.bf16 %v404_v47, %v404_v47  ;;  %691 = vperm.xlu2 %1388, %v668_v23  }
  0x98   : > { %v406_v54 = vpack.c.bf16 %v401_v50, %v401_v50  ;;  %v407_v55 = vpack.c.bf16 %v402_v51, %v402_v51  ;;  %v1615_v46 = vld [vmem:[%s1677_s5] ss:$0 sm:$0xff] }
  0x99   : > { %v464_v57 = vor.u32 %v462_v49, %v460_v48  ;;  %v435_v58 = vunpack.c.l.b16 %v408_v52  ;;  %v436_v59 = vunpack.c.l.b16 %v409_v53  ;;  %v1357_v49 = vld [vmem:[%s1678_s6 + $0x60] sm:$0xff]  ;;  %v1364_v52 = vld [vmem:[%s1678_s6 + $0x98] sm:$0xff] }
  0x9a   : > { %v433_v60 = vunpack.c.l.b16 %v406_v54  ;;  %v434_v61 = vunpack.c.l.b16 %v407_v55  ;;  %837 = vmatpush.bf16.msra.mxu3 %v1357_v49  ;;  %v1356_v55 = vld [vmem:[%s1678_s6 + $0x58] sm:$0xff] }
  0x9b   : > { %1156 = vmatmul.msk.bf16.vlgmr.msra.gmra.mxu2 %vm332_vm0, %v464_v57  ;;  %v439_v62 = vpack.c.b16 %v436_v59, %v435_v58  ;;  %v1363_v57 = vld [vmem:[%s1678_s6 + $0x90] sm:$0xff] }
  0x9c   : > { %v438_v63 = vpack.c.b16 %v434_v61, %v433_v60  ;;  %626 = vmatpush.bf16.msra.mxu2 %v1344_v56  ;;  %v1355_v61 = vld [vmem:[%s1678_s6 + $0x50] sm:$0xff] }
  0x9d   : > { %v450_v3 = vshll.u32 %v439_v62, 16  ;;  %v454_v10 = vshrl.u32 %v439_v62, 16  ;;  %v585_v14 = vrot.slane %v439_v62, 1 }
  0x9e   : > { %1173 = vmatmul.msk.bf16.vlgmr.msra.gmra.mxu1 %vm332_vm0, %v438_v63  ;;  %v443_v1 = vshrl.u32 %v438_v63, 16  ;;  %v445_v2 = vshll.u32 %v438_v63, 16  ;;  %v584_v13 = vrot.slane %v438_v63, 1  ;;  %838 = vmatpush.bf16.msra.mxu3 %v1356_v55  ;;  %v1362_v63 = vld [vmem:[%s1678_s6 + $0x88] sm:$0xff] }
  0x9f   : > { %v452_v7 = vrot.slane %v450_v3, 1  ;;  %v588_v22 = vsel %vm583_vm12, %v585_v14, %v587_v21 }
  0xa0   : > { %v447_v4 = vrot.slane %v445_v2, 1  ;;  %627 = vmatpush.bf16.msra.mxu2 %v1343_v0  ;;  %v586_v15 = vsel %vm583_vm12, %v584_v13, %v585_v14  ;;  %v682_v14 = vpop.permute.xlu0 %681 }
  0xa1   : > { %v456_v11 = vor.u32 %v454_v10, %v452_v7 }
  0xa2   : > { %v448_v6 = vor.u32 %v447_v4, %v443_v1  ;;  %839 = vmatpush.bf16.msra.mxu3 %v1355_v61  ;;  %v1354_v1 = vld [vmem:[%s1678_s6 + $0x48] sm:$0xff] }
  0xa3   : > { %v461_v12 = vsel %vm441_vm11, %v456_v11, %v460_v48 }
  0xa4   : > { %v453_v8 = vsel %vm441_vm11, %v448_v6, %v452_v7  ;;  %628 = vmatpush.bf16.msra.mxu2 %v1342_v5  ;;  %v1361_v6 = vld [vmem:[%s1678_s6 + $0x80] sm:$0xff] }
  0xa5   : > { %1154 = vmatmul.msk.bf16.vlgmr.msra.gmra.mxu0 %vm332_vm0, %v453_v8 }
  0xa6   : > { %840 = vmatpush.bf16.msra.mxu3 %v1354_v1 }
  0xa8   : > { %629 = vmatpush.bf16.msra.mxu2 %v1341_v9  ;;  %v1353_v9 = vld [vmem:[%s1678_s6 + $0x40] sm:$0xff] }
  0xaa   : > { %841 = vmatpush.bf16.msra.mxu3 %v1353_v9 }
  0xab   : > { %1175 = vmatmul.msk.bf16.vlgmr.msrb.gmra.mxu2 %vm332_vm0, %v1517_v44  ;;  %v1365_v44 = vld [vmem:[%s1678_s6 + $0xa0] sm:$0xff] }
  0xac   : > { %1007 = vmatpush.bf16.msrb.mxu1 %v1365_v44 }
  0xae   : > { %1174 = vmatmul.msk.bf16.gmra.mxu1 %vm332_vm0, %v439_v62 }
  0xb0   : > { %1008 = vmatpush.bf16.msrb.mxu1 %v1364_v52 }
  0xb4   : > { %1009 = vmatpush.bf16.msrb.mxu1 %v1363_v57 }
  0xb5   : > { %1155 = vmatmul.msk.bf16.gmra.mxu0 %vm332_vm0, %v461_v12 }
  0xb8   : > { %1010 = vmatpush.bf16.msrb.mxu1 %v1362_v63 }
  0xbb   : > { %1200 = vmatmul.msk.bf16.vlgmr.msra.gmra.mxu2 %vm332_vm0, %v586_v15 }
  0xbc   : > { %1011 = vmatpush.bf16.msrb.mxu1 %v1361_v6 }
  0xcb   : > { %1201 = vmatmul.msk.bf16.gmra.mxu2 %vm332_vm0, %v588_v22 }
  0xdb   : > { %1202 = vmatmul.msk.bf16.gmra.mxu2 %vm332_vm0, %v587_v21 }
  0xe1   : > { %v672_v54 = vpop.permute.xlu2 %671 }
  0xe9   : > { %v677_v5 = vpop.permute.xlu2 %676 }
  0xf1   : > { %v692_v40 = vpop.permute.xlu2 %691 }
 0x11b   : > { %v560_v38 = vpop.f32.mrf.mxu1 }
 0x11e   : > { %v1566_v25 = vpop.f32.mrf.mxu2 }
 0x122   : > { %v507_v35 = vpop.f32.mrf.mxu0 }
 0x123   : > { %v561_v45 = vadd.f32 %v560_v38, %v507_v35  ;;  %v562_v51 = vpop.f32.mrf.mxu1 }
 0x126   : > { %v519_v28 = vpop.f32.mrf.mxu2 }
 0x12a   : > { %v509_v47 = vpop.f32.mrf.mxu0 }
 0x12b   : > { %v563_v58 = vadd.f32 %v562_v51, %v509_v47  ;;  %v565_v3 = vpop.f32.mrf.mxu1 }
 0x12e   : > { %v1580_v31 = vpop.f32.mrf.mxu2 }
 0x12f   : > { %v571_v33 = vadd.f32 %v1580_v31, %v1566_v25 }
 0x132   : > { %v512_v0 = vpop.f32.mrf.mxu0 }
 0x133   : > { %v566_v7 = vadd.f32 %v565_v3, %v512_v0  ;;  %v567_v17 = vpop.f32.mrf.mxu1 }
 0x136   : > { %v572_v39 = vpop.f32.mrf.mxu2 }
 0x13a   : > { %v514_v13 = vpop.f32.mrf.mxu0 }
 0x13b   : > { %v568_v18 = vadd.f32 %v567_v17, %v514_v13 }
 0x13e   : > { %v631_v48 = vpop.f32.mrf.mxu2 }
 0x13f   : > { %v645_v50 = vadd.f32 %v631_v48, %v561_v45 }
 0x141   : > { %v654_v53 = vadd.f32 %v1615_v46, %v645_v50 }
 0x143   : > { %v659_v56 = vmax.f32 %v654_v53, 0.0 }
 0x145   : > { %v694_v59 = vmul.f32 %v672_v54, %v659_v56 }
 0x146   : > { %v633_v60 = vpop.f32.mrf.mxu2 }
 0x147   : > { %699 = vst [vmem:[#allocation3 + $0x1] sm:$0xff] %v694_v59  ;;  %v646_v62 = vadd.f32 %v633_v60, %v563_v58 }
 0x149   : > { %v655_v2 = vadd.f32 %v1615_v46, %v646_v62 }
 0x14b   : > { %v660_v4 = vmax.f32 %v655_v2, 0.0 }
 0x14d   : > { %v695_v8 = vmul.f32 %v677_v5, %v660_v4 }
 0x14e   : > { %v636_v10 = vpop.f32.mrf.mxu2  ;;  %v704_v15 = vld [vmem:[#allocation3] sm:$0xff] }
 0x14f   : > { %700 = vst [vmem:[#allocation3 + $0x9] sm:$0xff] %v695_v8  ;;  %v647_v11 = vadd.f32 %v636_v10, %v566_v7  ;;  %v709_v20 = vpack.c.bf16 %v704_v15, %v704_v15 }
 0x151   : > { %v656_v12 = vadd.f32 %v1615_v46, %v647_v11  ;;  %v752_v27 = vunpack.c.l.b16 %v709_v20 }
 0x153   : > { %v661_v16 = vmax.f32 %v656_v12, 0.0 }
 0x155   : > { %v696_v19 = vmul.f32 %v682_v14, %v661_v16  ;;  %v1392_v14 = vld [vmem:[%s1679_s7] ss:$0 sm:$0xff] }
 0x156   : > { %v638_v21 = vpop.f32.mrf.mxu2  ;;  %v705_v22 = vld [vmem:[#allocation3 + $0x8] sm:$0xff] }
 0x157   : > { %701 = vst [vmem:[#allocation3 + $0x11] sm:$0xff] %v696_v19  ;;  %v648_v23 = vadd.f32 %v638_v21, %v568_v18  ;;  %v710_v24 = vpack.c.bf16 %v705_v22, %v705_v22 }
 0x159   : > { %v657_v26 = vadd.f32 %v1615_v46, %v648_v23  ;;  %v753_v28 = vunpack.c.l.b16 %v710_v24 }
 0x15b   : > { %v662_v30 = vmax.f32 %v657_v26, 0.0  ;;  %v757_v32 = vpack.c.b16 %v753_v28, %v752_v27 }
 0x15d   : > { %v697_v34 = vmul.f32 %v687_v29, %v662_v30  ;;  %916 = vmatmul.bf16.vlgmr.msrb.gmra.mxu0 %v757_v32  ;;  %v763_v47 = vshll.u32 %v757_v32, 16  ;;  %v948_v50 = vrot.slane %v757_v32, 1  ;;  %v761_v52 = vshrl.u32 %v757_v32, 16 }
 0x15e   : > { %v641_v35 = vpop.f32.mrf.mxu2  ;;  %v706_v38 = vld [vmem:[#allocation3 + $0x10] sm:$0xff] }
 0x15f   : > { %702 = vst [vmem:[#allocation3 + $0x19] sm:$0xff] %v697_v34  ;;  %v649_v36 = vadd.f32 %v641_v35, %v571_v33  ;;  %v711_v42 = vpack.c.bf16 %v706_v38, %v706_v38  ;;  %v765_v31 = vrot.slane %v763_v47, 1 }
 0x161   : > { %v658_v37 = vadd.f32 %v1615_v46, %v649_v36  ;;  %v754_v48 = vunpack.c.l.b16 %v711_v42  ;;  %v766_v55 = vor.u32 %v765_v31, %v761_v52 }
 0x163   : > { %v663_v39 = vmax.f32 %v658_v37, 0.0 }
 0x165   : > { %v698_v41 = vmul.f32 %v692_v40, %v663_v39 }
 0x166   : > { %v643_v43 = vpop.f32.mrf.mxu2  ;;  %v707_v44 = vld [vmem:[#allocation3 + $0x18] sm:$0xff] }
 0x167   : > { %703 = vst [vmem:[#allocation3 + $0x21] sm:$0x3] %v698_v41  ;;  %v712_v45 = vpack.c.bf16 %v707_v44, %v707_v44 }
 0x169   : > { %v755_v49 = vunpack.c.l.b16 %v712_v45 }
 0x16b   : > { %v758_v25 = vpack.c.b16 %v755_v49, %v754_v48 }
 0x16d   : > { %921 = vmatmul.bf16.gmra.mxu0 %v758_v25  ;;  %v949_v51 = vrot.slane %v758_v25, 1  ;;  %v768_v53 = vshll.u32 %v758_v25, 16  ;;  %v772_v63 = vshrl.u32 %v758_v25, 16 }
 0x16e   : > { %v708_v46 = vld [vmem:[#allocation3 + $0x20] sm:$0xf] }
 0x16f   : > { %v950_v54 = vsel %vm583_vm12, %v948_v50, %v949_v51  ;;  %v770_v56 = vrot.slane %v768_v53, 1  ;;  %v713_v57 = vpack.c.bf16 %v708_v46, %v708_v46 }
 0x170   : > { %1012 = vmatmul.bf16.vlgmr.msrb.gmra.mxu1 %v950_v54 }
 0x171   : > { %v771_v58 = vsel %vm441_vm11, %v766_v55, %v770_v56  ;;  %v756_v59 = vunpack.c.l.b16 %v713_v57  ;;  %v774_v2 = vor.u32 %v772_v63, %v770_v56 }
 0x172   : > { %842 = vmatmul.bf16.vlgmr.msra.gmra.mxu3 %v771_v58 }
 0x173   : > { %v759_v60 = vpack.c.b16 %v756_v59, %v756_v59 }
 0x175   : > { %v776_v61 = vshll.u32 %v759_v60, 16  ;;  %v951_v62 = vrot.slane %v759_v60, 1  ;;  %v780_v4 = vshrl.u32 %v759_v60, 16 }
 0x177   : > { %v778_v0 = vrot.slane %v776_v61, 1  ;;  %v952_v1 = vsel %vm583_vm12, %v949_v51, %v951_v62 }
 0x179   : > { %v779_v3 = vsel %vm441_vm11, %v774_v2, %v778_v0  ;;  %v782_v5 = vor.u32 %v780_v4, %v778_v0 }
 0x17d   : > { %926 = vmatmul.bf16.gmra.mxu0 %v759_v60 }
 0x180   : > { %1017 = vmatmul.bf16.gmra.mxu1 %v952_v1 }
 0x182   : > { %847 = vmatmul.bf16.gmra.mxu3 %v779_v3 }
 0x190   : > { %1022 = vmatmul.bf16.gmra.mxu1 %v951_v62 }
 0x192   : > { %852 = vmatmul.bf16.gmra.mxu3 %v782_v5 }
 0x1da   : > { %v917_v6 = vpop.f32.mrf.mxu0 }
 0x1e2   : > { %v919_v7 = vpop.f32.mrf.mxu0 }
 0x1ea   : > { %v922_v8 = vpop.f32.mrf.mxu0 }
 0x1ed   : > { %v1013_v9 = vpop.f32.mrf.mxu1 }
 0x1f2   : > { %v924_v10 = vpop.f32.mrf.mxu0 }
 0x1f5   : > { %v843_v11 = vpop.f32.mrf.mxu3  ;;  %v1015_v12 = vpop.f32.mrf.mxu1 }
 0x1f6   : > { %v918_v13 = vadd.f32 %v917_v6, %v843_v11 }
 0x1f8   : > { %v1027_v15 = vadd.f32 %v1013_v9, %v918_v13 }
 0x1fa   : > { %v1036_v16 = vadd.f32 %v1392_v14, %v1027_v15  ;;  %v927_v17 = vpop.f32.mrf.mxu0 }
 0x1fc   : > { %v1041_v18 = vmax.f32 %v1036_v16, 0.0 }
 0x1fd   : > { %v845_v19 = vpop.f32.mrf.mxu3  ;;  %v1018_v20 = vpop.f32.mrf.mxu1 }
 0x1fe   : > { %1046 = vst [vmem:[%s1662_s12] sm:$0xff] %v1041_v18  ;;  %v920_v21 = vadd.f32 %v919_v7, %v845_v19 }
 0x200   : > { %v1028_v22 = vadd.f32 %v1015_v12, %v920_v21 }
 0x202   : > { %v1037_v23 = vadd.f32 %v1392_v14, %v1028_v22  ;;  %v929_v24 = vpop.f32.mrf.mxu0 }
 0x204   : > { %v1042_v26 = vmax.f32 %v1037_v23, 0.0 }
 0x205   : > { %v848_v27 = vpop.f32.mrf.mxu3  ;;  %v1020_v28 = vpop.f32.mrf.mxu1 }
 0x206   : > { %1047 = vst [vmem:[%s1662_s12 + $0x8] sm:$0xff] %v1042_v26  ;;  %v923_v29 = vadd.f32 %v922_v8, %v848_v27 }
 0x208   : > { %v1029_v30 = vadd.f32 %v1018_v20, %v923_v29 }
 0x20a   : > { %v1038_v32 = vadd.f32 %v1392_v14, %v1029_v30 }
 0x20c   : > { %v1043_v33 = vmax.f32 %v1038_v32, 0.0 }
 0x20d   : > { %v850_v34 = vpop.f32.mrf.mxu3  ;;  %v1023_v35 = vpop.f32.mrf.mxu1 }
 0x20e   : > { %1048 = vst [vmem:[%s1662_s12 + $0xe] sm:$0xfc] %v1043_v33  ;;  %v925_v36 = vadd.f32 %v924_v10, %v850_v34 }
 0x210   : > { %v1030_v37 = vadd.f32 %v1020_v28, %v925_v36 }
 0x212   : > { %v1039_v38 = vadd.f32 %v1392_v14, %v1030_v37 }
 0x214   : > { %v1044_v39 = vmax.f32 %v1039_v38, 0.0 }
 0x215   : > { %v853_v40 = vpop.f32.mrf.mxu3  ;;  %v1025_v41 = vpop.f32.mrf.mxu1 }
 0x216   : > { %1049 = vst [vmem:[%s1662_s12 + $0x16] sm:$0xff] %v1044_v39  ;;  %v928_v42 = vadd.f32 %v927_v17, %v853_v40 }
 0x218   : > { %v1031_v43 = vadd.f32 %v1023_v35, %v928_v42 }
 0x21a   : > { %v1040_v44 = vadd.f32 %v1392_v14, %v1031_v43 }
 0x21c   : > { %v1045_v45 = vmax.f32 %v1040_v44, 0.0 }
 0x21d   : > { %v855_v47 = vpop.f32.mrf.mxu3 }
 0x21e   : > { %1050 = vst [vmem:[%s1662_s12 + $0x1e] sm:$0x3] %v1045_v45 }
 0x21f PF: > { %s18_s27 = sadd.s32 1, %s1399_s27  }
 0x220   : > { %p15_p4 = scmp.ge.s32.totalorder %s18_s27, 4  }
 0x222   :  { %17 = sbr.rel (!%p15_p4) target bundleno = 1 (0x1), region = 89 }

</bundles_post_ra>
